<compile_context>
chip_gen: v6e
topology: v6e:2x2x1
jax: 0.10.0
libtpu: 0.0.40
codegen_flags: <defaults>
</compile_context>

<pallas_src>
import functools

import jax
import jax.numpy as jnp
from jax import lax
from jax.experimental import pallas as pl
from jax.experimental.pallas import tpu as pltpu


# --------------------------------------------------------------------------- #
# Helpers
# --------------------------------------------------------------------------- #
def _choose_t_block(T, B, max_rows=512):
    """Largest time-block Tblk dividing T whose (Tblk*B, .) slab stays bounded
    and keeps blocks tile-aligned when Tblk < T."""
    if T * B <= max_rows:
        return T
    for d in range(T - 1, 0, -1):
        if T % d == 0 and d * B <= max_rows and (d * B) % 128 == 0:
            return d
    return T  # fall back to a single (unblocked) pass


# --------------------------------------------------------------------------- #
# Kernel 1: RNN core.  x is the time-major (T*B, E) embedded token slab
# (row t*B + b  <->  token (b, t)).  Per time-block: ONE hoisted input-projection
# matmul, then only the HxH recurrence is serial.  All hidden states are written
# back into the same lane-dense (T*B, H) slab; final hidden state is (B, H).
# --------------------------------------------------------------------------- #
def _rnn_core_kernel(x_ref, wih_ref, whh_ref, b_ref, h0_ref,     # inputs
                     hs_ref, ht_ref,                              # outputs
                     h_scr,                                       # scratch
                     *, t_block, batch):
    i = pl.program_id(0)

    @pl.when(i == 0)
    def _():
        h_scr[...] = h0_ref[...]

    # Hoisted input projection + bias for the whole time-block (one MXU call):
    #   P_t = x_t @ W_ih^T + (b_ih + b_hh), stored into the hidden-state slab.
    p = jnp.dot(x_ref[...], wih_ref[...],
                preferred_element_type=jnp.float32) + b_ref[...]
    hs_ref[...] = p.astype(hs_ref.dtype)

    def step(t, h_prev):                                          # h_prev: (B, H) f32
        start = t * batch
        if not isinstance(start, int):
            start = pl.multiple_of(start, batch)
        h_lin = jnp.dot(h_prev.astype(whh_ref.dtype), whh_ref[...],
                        preferred_element_type=jnp.float32)
        h_new = jnp.tanh(hs_ref[pl.ds(start, batch), :].astype(jnp.float32) + h_lin)
        hs_ref[pl.ds(start, batch), :] = h_new.astype(hs_ref.dtype)
        return h_new

    if t_block <= 32:
        # Small time-block: full static unroll (static sublane offsets).
        h_last = h_scr[...]
        for t in range(t_block):
            h_last = step(t, h_last)
    else:
        # Large time-block: bounded unroll keeps code size / vreg pressure sane.
        h_last = lax.fori_loop(0, t_block, step, h_scr[...], unroll=8)

    h_scr[...] = h_last

    @pl.when(i == pl.num_programs(0) - 1)
    def _():
        ht_ref[...] = h_last


def run_rnn_core(x2d, wih_t, whh_t, b, h0, t_block, T, B, hs_dtype):
    N, E = x2d.shape
    H = whh_t.shape[1]
    kernel = functools.partial(_rnn_core_kernel, t_block=t_block, batch=B)
    return pl.pallas_call(
        kernel,
        grid=(T // t_block,),
        out_shape=(jax.ShapeDtypeStruct((N, H), hs_dtype),        # all hidden states
                   jax.ShapeDtypeStruct((B, H), jnp.float32)),    # final hidden state
        in_specs=[
            pl.BlockSpec((t_block * B, E), lambda i: (i, 0)),     # x time-block
            pl.BlockSpec((E, H), lambda i: (0, 0)),               # W_ih^T (resident)
            pl.BlockSpec((H, H), lambda i: (0, 0)),               # W_hh^T (resident)
            pl.BlockSpec((1, H), lambda i: (0, 0)),               # b_ih + b_hh
            pl.BlockSpec((B, H), lambda i: (0, 0)),               # h_0
        ],
        out_specs=(
            pl.BlockSpec((t_block * B, H), lambda i: (i, 0)),
            pl.BlockSpec((B, H), lambda i: (0, 0)),
        ),
        scratch_shapes=[pltpu.VMEM((B, H), jnp.float32)],         # h across time-blocks
        compiler_params=pltpu.CompilerParams(
            dimension_semantics=("arbitrary",),                   # serial recurrence
            vmem_limit_bytes=64 * 1024 * 1024),
    )(x2d, wih_t, whh_t, b, h0)


# --------------------------------------------------------------------------- #
# Kernel 2a: output head fused with cross-entropy (training branch).
# Gridded over time-blocks; the (T*B, C) logits are never materialized in HBM.
# --------------------------------------------------------------------------- #
def _head_ce_kernel(hs_ref, labels_ref, vw_ref, vb_ref, loss_ref, acc_ref,
                    *, n_total):
    i = pl.program_id(0)

    @pl.when(i == 0)
    def _():
        acc_ref[0] = 0.0

    logits = (jnp.dot(hs_ref[...], vw_ref[...],
                      preferred_element_type=jnp.float32) + vb_ref[...])   # (Nblk, C)
    labels = labels_ref[...]                                               # (Nblk, 1)
    m = jnp.max(logits, axis=-1, keepdims=True)
    lse = m + jnp.log(jnp.sum(jnp.exp(logits - m), axis=-1, keepdims=True))
    cls = lax.broadcasted_iota(jnp.int32, logits.shape, 1)
    true_logit = jnp.sum(jnp.where(cls == labels, logits, 0.0),
                         axis=-1, keepdims=True)
    acc_ref[0] += jnp.sum(lse - true_logit)

    @pl.when(i == pl.num_programs(0) - 1)
    def _():
        loss_ref[0, 0] = acc_ref[0] * (1.0 / n_total)


def run_head_ce(hs, labels_tm, vw_t, vb, t_block, T, B):
    N, H = hs.shape
    C = vw_t.shape[1]
    kernel = functools.partial(_head_ce_kernel, n_total=float(N))
    return pl.pallas_call(
        kernel,
        grid=(T // t_block,),
        out_shape=jax.ShapeDtypeStruct((1, 1), jnp.float32),
        in_specs=[
            pl.BlockSpec((t_block * B, H), lambda i: (i, 0)),     # hidden states
            pl.BlockSpec((t_block * B, 1), lambda i: (i, 0)),     # labels (time-major)
            pl.BlockSpec((H, C), lambda i: (0, 0)),               # V.weight^T (resident)
            pl.BlockSpec((1, C), lambda i: (0, 0)),               # V.bias
        ],
        out_specs=pl.BlockSpec((1, 1), lambda i: (0, 0),
                               memory_space=pltpu.MemorySpace.SMEM),
        scratch_shapes=[pltpu.SMEM((1,), jnp.float32)],           # running CE sum
        compiler_params=pltpu.CompilerParams(
            dimension_semantics=("arbitrary",),                   # accumulator
            vmem_limit_bytes=64 * 1024 * 1024),
    )(hs, labels_tm, vw_t, vb)


# --------------------------------------------------------------------------- #
# Kernel 2b: output head + batched argmax (inference branch).
# Gridded ("parallel") over time-blocks; no logits writeback.
# --------------------------------------------------------------------------- #
def _head_argmax_kernel(hs_ref, vw_ref, vb_ref, am_ref):
    logits = (jnp.dot(hs_ref[...], vw_ref[...],
                      preferred_element_type=jnp.float32) + vb_ref[...])   # (Nblk, C)
    # One batched argmax per time-block (the per-step argmax/stores of the old
    # kernel are gone); the (Nblk, 1) int32 store is masked but only Nblk*4 bytes.
    am_ref[...] = jnp.argmax(logits, axis=-1, keepdims=True).astype(jnp.int32)


def run_head_argmax(hs, vw_t, vb, t_block, T, B):
    N, H = hs.shape
    C = vw_t.shape[1]
    return pl.pallas_call(
        _head_argmax_kernel,
        grid=(T // t_block,),
        out_shape=jax.ShapeDtypeStruct((N, 1), jnp.int32),
        in_specs=[
            pl.BlockSpec((t_block * B, H), lambda i: (i, 0)),
            pl.BlockSpec((H, C), lambda i: (0, 0)),
            pl.BlockSpec((1, C), lambda i: (0, 0)),
        ],
        out_specs=pl.BlockSpec((t_block * B, 1), lambda i: (i, 0)),
        compiler_params=pltpu.CompilerParams(
            dimension_semantics=("parallel",),                    # independent blocks
            vmem_limit_bytes=64 * 1024 * 1024),
    )(hs, vw_t, vb)


# --------------------------------------------------------------------------- #
# Parameters (deterministic init, PyTorch layer shapes; f32 masters)
# --------------------------------------------------------------------------- #
def init_params(key, corpus_len, embedding_num, hidden_size):
    k = jax.random.split(key, 7)
    s = 1.0 / (hidden_size ** 0.5)
    return {
        "embedding": jax.random.normal(k[0], (corpus_len, embedding_num), jnp.float32),
        "w_ih": jax.random.uniform(k[1], (hidden_size, embedding_num), jnp.float32, -s, s),
        "w_hh": jax.random.uniform(k[2], (hidden_size, hidden_size), jnp.float32, -s, s),
        "b_ih": jax.random.uniform(k[3], (hidden_size,), jnp.float32, -s, s),
        "b_hh": jax.random.uniform(k[4], (hidden_size,), jnp.float32, -s, s),
        "v_w": jax.random.uniform(k[5], (corpus_len, hidden_size), jnp.float32, -s, s),
        "v_b": jax.random.uniform(k[6], (corpus_len,), jnp.float32, -s, s),
    }


# --------------------------------------------------------------------------- #
# Forward (mirrors Model.forward)
# --------------------------------------------------------------------------- #
def model_forward(params, x, label=None, h_0=None, compute_dtype=jnp.bfloat16):
    """x: (B, T) int token ids."""
    B, T = x.shape
    H = params["w_hh"].shape[0]

    # Time-major token stream: row t*B + b of every 2-D slab <-> token (b, t).
    # The embedding gather lands directly in that layout (no activation
    # transpose pass) and is down-cast once for the bf16 MXU path.
    tok_tm = x.T.reshape(-1)
    x2d = jnp.take(params["embedding"], tok_tm, axis=0).astype(compute_dtype)

    wih_t = params["w_ih"].T.astype(compute_dtype)                # (E, H)
    whh_t = params["w_hh"].T.astype(compute_dtype)                # (H, H)
    b = (params["b_ih"] + params["b_hh"]).astype(jnp.float32)[None, :]   # (1, H)
    vw_t = params["v_w"].T.astype(compute_dtype)                  # (H, C)
    vb = params["v_b"].astype(jnp.float32)[None, :]               # (1, C)

    # PyTorch: training branch calls self.rnn(x) -> zero initial hidden state.
    if label is not None or h_0 is None:
        h0 = jnp.zeros((B, H), jnp.float32)
    else:
        h0 = jnp.asarray(h_0, jnp.float32).reshape(B, H)

    t_block = _choose_t_block(T, B)
    hs, ht = run_rnn_core(x2d, wih_t, whh_t, b, h0, t_block, T, B, compute_dtype)

    if label is not None:
        labels_tm = label.T.reshape(-1, 1).astype(jnp.int32)      # time-major (T*B, 1)
        loss = run_head_ce(hs, labels_tm, vw_t, vb, t_block, T, B)
        return loss[0, 0]

    am = run_head_argmax(hs, vw_t, vb, t_block, T, B)             # (T*B, 1) int32
    pred = am.reshape(T, B).T                                     # (B, T)
    return pred, ht[None, :, :]                                   # t: (1, B, H)


# --------------------------------------------------------------------------- #
# Pure-JAX f32 reference (for sanity checking the kernels)
# --------------------------------------------------------------------------- #
def reference_forward(params, x, label=None, h_0=None):
    B, T = x.shape
    H = params["w_hh"].shape[0]
    emb = params["embedding"][x]                                  # (B, T, E)
    if label is not None or h_0 is None:
        h = jnp.zeros((B, H), jnp.float32)
    else:
        h = jnp.asarray(h_0, jnp.float32).reshape(B, H)
    hs = []
    for t in range(T):
        h = jnp.tanh(emb[:, t] @ params["w_ih"].T + params["b_ih"]
                     + h @ params["w_hh"].T + params["b_hh"])
        hs.append(h)
    o = jnp.stack(hs, axis=1)                                     # (B, T, H)
    pre = o @ params["v_w"].T + params["v_b"]                     # (B, T, C)
    if label is not None:
        logits = pre.reshape(B * T, -1)
        lbl = label.reshape(-1)
        lse = jax.nn.logsumexp(logits, axis=-1)
        return jnp.mean(lse - logits[jnp.arange(B * T), lbl])
    return jnp.argmax(pre, axis=-1), h[None, :, :]


if __name__ == "__main__":
    corpus_len, embedding_num, hidden_size = 64, 32, 32
    B, T = 2, 8

    key = jax.random.PRNGKey(0)
    kp, kx, kl = jax.random.split(key, 3)
    params = init_params(kp, corpus_len, embedding_num, hidden_size)

    x = jax.random.randint(kx, (B, T), 0, corpus_len, dtype=jnp.int32)
    label = jax.random.randint(kl, (B, T), 0, corpus_len, dtype=jnp.int32)
    h_0 = jnp.zeros((1, B, hidden_size), jnp.float32)

    # Inference branch: (argmax preds, final hidden state).
    pred, t = model_forward(params, x, h_0=h_0)
    # Training branch: scalar cross-entropy loss.
    loss = model_forward(params, x, label=label)
    jax.block_until_ready((pred, t, loss))

    assert pred.shape == (B, T) and t.shape == (1, B, hidden_size) and loss.shape == ()

    # Loose-tolerance sanity check against the f32 reference (kernels run the
    # MXU in bf16 with f32 accumulation, so results differ only at bf16 level).
    _pred_ref, t_ref = reference_forward(params, x, h_0=h_0)
    loss_ref = reference_forward(params, x, label=label)
    assert jnp.allclose(t, t_ref, rtol=5e-2, atol=5e-2)
    assert jnp.allclose(loss, loss_ref, rtol=5e-2, atol=5e-2)

    print("KERNEL_OK")
</pallas_src>

<mosaic_0001>
module attributes {stable_mosaic.version = 11 : i64} {
  func.func @_rnn_core_kernel(%arg0: i32, %arg1: memref<16x32xbf16, #tpu.memory_space<vmem>>, %arg2: memref<32x32xbf16, #tpu.memory_space<vmem>>, %arg3: memref<32x32xbf16, #tpu.memory_space<vmem>>, %arg4: memref<1x32xf32, #tpu.memory_space<vmem>>, %arg5: memref<2x32xf32, #tpu.memory_space<vmem>>, %arg6: memref<16x32xbf16, #tpu.memory_space<vmem>>, %arg7: memref<2x32xf32, #tpu.memory_space<vmem>>, %arg8: memref<2x32xf32, #tpu.memory_space<vmem>>) attributes {dimension_semantics = [#tpu.dimension_semantics<arbitrary>], iteration_bounds = array<i64: 1>, scalar_prefetch = 0 : i64, scratch_operands = 1 : i64, tpu.core_type = #tpu.core_type<tc>, window_params = [{transform_indices = @transform_0, window_bounds = array<i64: 16, 32>}, {pipeline_mode = #tpu.pipeline_mode<synchronous>, transform_indices = @transform_1, window_bounds = array<i64: 32, 32>}, {pipeline_mode = #tpu.pipeline_mode<synchronous>, transform_indices = @transform_2, window_bounds = array<i64: 32, 32>}, {pipeline_mode = #tpu.pipeline_mode<synchronous>, transform_indices = @transform_3, window_bounds = array<i64: 1, 32>}, {pipeline_mode = #tpu.pipeline_mode<synchronous>, transform_indices = @transform_4, window_bounds = array<i64: 2, 32>}, {transform_indices = @transform_5, window_bounds = array<i64: 16, 32>}, {pipeline_mode = #tpu.pipeline_mode<synchronous>, transform_indices = @transform_6, window_bounds = array<i64: 2, 32>}]} {
    %c0_i32 = arith.constant 0 : i32
    %0 = arith.cmpi eq, %arg0, %c0_i32 : i32
    %1 = arith.extui %0 : i1 to i32
    %c0_i32_0 = arith.constant 0 : i32
    %2 = arith.cmpi ne, %1, %c0_i32_0 : i32
    scf.if %2 {
      %c0_63 = arith.constant 0 : index
      %c0_64 = arith.constant 0 : index
      %88 = vector.load %arg5[%c0_63, %c0_64] : memref<2x32xf32, #tpu.memory_space<vmem>>, vector<2x32xf32>
      %c0_65 = arith.constant 0 : index
      %c0_66 = arith.constant 0 : index
      %89 = vector.load %arg8[%c0_65, %c0_66] : memref<2x32xf32, #tpu.memory_space<vmem>>, vector<2x32xf32>
      tpu.vector_store %arg8[%c0_65, %c0_66], %88 {strides = array<i32>} : memref<2x32xf32, #tpu.memory_space<vmem>>, vector<2x32xf32>,
    } else {
    }
    %c0 = arith.constant 0 : index
    %c0_1 = arith.constant 0 : index
    %3 = vector.load %arg1[%c0, %c0_1] : memref<16x32xbf16, #tpu.memory_space<vmem>>, vector<16x32xbf16>
    %c0_2 = arith.constant 0 : index
    %c0_3 = arith.constant 0 : index
    %4 = vector.load %arg2[%c0_2, %c0_3] : memref<32x32xbf16, #tpu.memory_space<vmem>>, vector<32x32xbf16>
    %cst = arith.constant dense<0.000000e+00> : vector<16x32xf32>
    %5 = tpu.matmul %3, %4, %cst {dimension_numbers = #tpu.dot_dimension_numbers<[1], [0], [0], [1], [0, 0, 1, 1], [], []>} : vector<16x32xbf16>, vector<32x32xbf16>, vector<16x32xf32> -> vector<16x32xf32>
    %c0_4 = arith.constant 0 : index
    %c0_5 = arith.constant 0 : index
    %6 = vector.load %arg4[%c0_4, %c0_5] : memref<1x32xf32, #tpu.memory_space<vmem>>, vector<1x32xf32>
    %7 = vector.broadcast %6 : vector<1x32xf32> to vector<16x32xf32>
    %8 = arith.addf %5, %7 : vector<16x32xf32>
    %9 = arith.truncf %8 : vector<16x32xf32> to vector<16x32xbf16>
    %c0_6 = arith.constant 0 : index
    %c0_7 = arith.constant 0 : index
    %10 = vector.load %arg6[%c0_6, %c0_7] : memref<16x32xbf16, #tpu.memory_space<vmem>>, vector<16x32xbf16>
    tpu.vector_store %arg6[%c0_6, %c0_7], %9 {strides = array<i32>} : memref<16x32xbf16, #tpu.memory_space<vmem>>, vector<16x32xbf16>,
    %c0_8 = arith.constant 0 : index
    %c0_9 = arith.constant 0 : index
    %11 = vector.load %arg8[%c0_8, %c0_9] : memref<2x32xf32, #tpu.memory_space<vmem>>, vector<2x32xf32>
    %12 = arith.truncf %11 : vector<2x32xf32> to vector<2x32xbf16>
    %c0_10 = arith.constant 0 : index
    %c0_11 = arith.constant 0 : index
    %13 = vector.load %arg3[%c0_10, %c0_11] : memref<32x32xbf16, #tpu.memory_space<vmem>>, vector<32x32xbf16>
    %cst_12 = arith.constant dense<0.000000e+00> : vector<2x32xf32>
    %14 = tpu.matmul %12, %13, %cst_12 {dimension_numbers = #tpu.dot_dimension_numbers<[1], [0], [0], [1], [0, 0, 1, 1], [], []>} : vector<2x32xbf16>, vector<32x32xbf16>, vector<2x32xf32> -> vector<2x32xf32>
    %c0_13 = arith.constant 0 : index
    %c0_14 = arith.constant 0 : index
    %15 = vector.load %arg6[%c0_13, %c0_14] : memref<16x32xbf16, #tpu.memory_space<vmem>>, vector<2x32xbf16>
    %16 = arith.extf %15 : vector<2x32xbf16> to vector<2x32xf32>
    %17 = arith.addf %16, %14 : vector<2x32xf32>
    %18 = math.tanh %17 : vector<2x32xf32>
    %19 = arith.truncf %18 : vector<2x32xf32> to vector<2x32xbf16>
    %c0_15 = arith.constant 0 : index
    %c0_16 = arith.constant 0 : index
    %20 = vector.load %arg6[%c0_15, %c0_16] : memref<16x32xbf16, #tpu.memory_space<vmem>>, vector<2x32xbf16>
    tpu.vector_store %arg6[%c0_15, %c0_16], %19 {strides = array<i32>} : memref<16x32xbf16, #tpu.memory_space<vmem>>, vector<2x32xbf16>,
    %21 = arith.truncf %18 : vector<2x32xf32> to vector<2x32xbf16>
    %c0_17 = arith.constant 0 : index
    %c0_18 = arith.constant 0 : index
    %22 = vector.load %arg3[%c0_17, %c0_18] : memref<32x32xbf16, #tpu.memory_space<vmem>>, vector<32x32xbf16>
    %cst_19 = arith.constant dense<0.000000e+00> : vector<2x32xf32>
    %23 = tpu.matmul %21, %22, %cst_19 {dimension_numbers = #tpu.dot_dimension_numbers<[1], [0], [0], [1], [0, 0, 1, 1], [], []>} : vector<2x32xbf16>, vector<32x32xbf16>, vector<2x32xf32> -> vector<2x32xf32>
    %c2 = arith.constant 2 : index
    %c0_20 = arith.constant 0 : index
    %24 = vector.load %arg6[%c2, %c0_20] : memref<16x32xbf16, #tpu.memory_space<vmem>>, vector<2x32xbf16>
    %25 = arith.extf %24 : vector<2x32xbf16> to vector<2x32xf32>
    %26 = arith.addf %25, %23 : vector<2x32xf32>
    %27 = math.tanh %26 : vector<2x32xf32>
    %28 = arith.truncf %27 : vector<2x32xf32> to vector<2x32xbf16>
    %c2_21 = arith.constant 2 : index
    %c0_22 = arith.constant 0 : index
    %29 = vector.load %arg6[%c2_21, %c0_22] : memref<16x32xbf16, #tpu.memory_space<vmem>>, vector<2x32xbf16>
    tpu.vector_store %arg6[%c2_21, %c0_22], %28 {strides = array<i32>} : memref<16x32xbf16, #tpu.memory_space<vmem>>, vector<2x32xbf16>,
    %30 = arith.truncf %27 : vector<2x32xf32> to vector<2x32xbf16>
    %c0_23 = arith.constant 0 : index
    %c0_24 = arith.constant 0 : index
    %31 = vector.load %arg3[%c0_23, %c0_24] : memref<32x32xbf16, #tpu.memory_space<vmem>>, vector<32x32xbf16>
    %cst_25 = arith.constant dense<0.000000e+00> : vector<2x32xf32>
    %32 = tpu.matmul %30, %31, %cst_25 {dimension_numbers = #tpu.dot_dimension_numbers<[1], [0], [0], [1], [0, 0, 1, 1], [], []>} : vector<2x32xbf16>, vector<32x32xbf16>, vector<2x32xf32> -> vector<2x32xf32>
    %c4 = arith.constant 4 : index
    %c0_26 = arith.constant 0 : index
    %33 = vector.load %arg6[%c4, %c0_26] : memref<16x32xbf16, #tpu.memory_space<vmem>>, vector<2x32xbf16>
    %34 = arith.extf %33 : vector<2x32xbf16> to vector<2x32xf32>
    %35 = arith.addf %34, %32 : vector<2x32xf32>
    %36 = math.tanh %35 : vector<2x32xf32>
    %37 = arith.truncf %36 : vector<2x32xf32> to vector<2x32xbf16>
    %c4_27 = arith.constant 4 : index
    %c0_28 = arith.constant 0 : index
    %38 = vector.load %arg6[%c4_27, %c0_28] : memref<16x32xbf16, #tpu.memory_space<vmem>>, vector<2x32xbf16>
    tpu.vector_store %arg6[%c4_27, %c0_28], %37 {strides = array<i32>} : memref<16x32xbf16, #tpu.memory_space<vmem>>, vector<2x32xbf16>,
    %39 = arith.truncf %36 : vector<2x32xf32> to vector<2x32xbf16>
    %c0_29 = arith.constant 0 : index
    %c0_30 = arith.constant 0 : index
    %40 = vector.load %arg3[%c0_29, %c0_30] : memref<32x32xbf16, #tpu.memory_space<vmem>>, vector<32x32xbf16>
    %cst_31 = arith.constant dense<0.000000e+00> : vector<2x32xf32>
    %41 = tpu.matmul %39, %40, %cst_31 {dimension_numbers = #tpu.dot_dimension_numbers<[1], [0], [0], [1], [0, 0, 1, 1], [], []>} : vector<2x32xbf16>, vector<32x32xbf16>, vector<2x32xf32> -> vector<2x32xf32>
    %c6 = arith.constant 6 : index
    %c0_32 = arith.constant 0 : index
    %42 = vector.load %arg6[%c6, %c0_32] : memref<16x32xbf16, #tpu.memory_space<vmem>>, vector<2x32xbf16>
    %43 = arith.extf %42 : vector<2x32xbf16> to vector<2x32xf32>
    %44 = arith.addf %43, %41 : vector<2x32xf32>
    %45 = math.tanh %44 : vector<2x32xf32>
    %46 = arith.truncf %45 : vector<2x32xf32> to vector<2x32xbf16>
    %c6_33 = arith.constant 6 : index
    %c0_34 = arith.constant 0 : index
    %47 = vector.load %arg6[%c6_33, %c0_34] : memref<16x32xbf16, #tpu.memory_space<vmem>>, vector<2x32xbf16>
    tpu.vector_store %arg6[%c6_33, %c0_34], %46 {strides = array<i32>} : memref<16x32xbf16, #tpu.memory_space<vmem>>, vector<2x32xbf16>,
    %48 = arith.truncf %45 : vector<2x32xf32> to vector<2x32xbf16>
    %c0_35 = arith.constant 0 : index
    %c0_36 = arith.constant 0 : index
    %49 = vector.load %arg3[%c0_35, %c0_36] : memref<32x32xbf16, #tpu.memory_space<vmem>>, vector<32x32xbf16>
    %cst_37 = arith.constant dense<0.000000e+00> : vector<2x32xf32>
    %50 = tpu.matmul %48, %49, %cst_37 {dimension_numbers = #tpu.dot_dimension_numbers<[1], [0], [0], [1], [0, 0, 1, 1], [], []>} : vector<2x32xbf16>, vector<32x32xbf16>, vector<2x32xf32> -> vector<2x32xf32>
    %c8 = arith.constant 8 : index
    %c0_38 = arith.constant 0 : index
    %51 = vector.load %arg6[%c8, %c0_38] : memref<16x32xbf16, #tpu.memory_space<vmem>>, vector<2x32xbf16>
    %52 = arith.extf %51 : vector<2x32xbf16> to vector<2x32xf32>
    %53 = arith.addf %52, %50 : vector<2x32xf32>
    %54 = math.tanh %53 : vector<2x32xf32>
    %55 = arith.truncf %54 : vector<2x32xf32> to vector<2x32xbf16>
    %c8_39 = arith.constant 8 : index
    %c0_40 = arith.constant 0 : index
    %56 = vector.load %arg6[%c8_39, %c0_40] : memref<16x32xbf16, #tpu.memory_space<vmem>>, vector<2x32xbf16>
    tpu.vector_store %arg6[%c8_39, %c0_40], %55 {strides = array<i32>} : memref<16x32xbf16, #tpu.memory_space<vmem>>, vector<2x32xbf16>,
    %57 = arith.truncf %54 : vector<2x32xf32> to vector<2x32xbf16>
    %c0_41 = arith.constant 0 : index
    %c0_42 = arith.constant 0 : index
    %58 = vector.load %arg3[%c0_41, %c0_42] : memref<32x32xbf16, #tpu.memory_space<vmem>>, vector<32x32xbf16>
    %cst_43 = arith.constant dense<0.000000e+00> : vector<2x32xf32>
    %59 = tpu.matmul %57, %58, %cst_43 {dimension_numbers = #tpu.dot_dimension_numbers<[1], [0], [0], [1], [0, 0, 1, 1], [], []>} : vector<2x32xbf16>, vector<32x32xbf16>, vector<2x32xf32> -> vector<2x32xf32>
    %c10 = arith.constant 10 : index
    %c0_44 = arith.constant 0 : index
    %60 = vector.load %arg6[%c10, %c0_44] : memref<16x32xbf16, #tpu.memory_space<vmem>>, vector<2x32xbf16>
    %61 = arith.extf %60 : vector<2x32xbf16> to vector<2x32xf32>
    %62 = arith.addf %61, %59 : vector<2x32xf32>
    %63 = math.tanh %62 : vector<2x32xf32>
    %64 = arith.truncf %63 : vector<2x32xf32> to vector<2x32xbf16>
    %c10_45 = arith.constant 10 : index
    %c0_46 = arith.constant 0 : index
    %65 = vector.load %arg6[%c10_45, %c0_46] : memref<16x32xbf16, #tpu.memory_space<vmem>>, vector<2x32xbf16>
    tpu.vector_store %arg6[%c10_45, %c0_46], %64 {strides = array<i32>} : memref<16x32xbf16, #tpu.memory_space<vmem>>, vector<2x32xbf16>,
    %66 = arith.truncf %63 : vector<2x32xf32> to vector<2x32xbf16>
    %c0_47 = arith.constant 0 : index
    %c0_48 = arith.constant 0 : index
    %67 = vector.load %arg3[%c0_47, %c0_48] : memref<32x32xbf16, #tpu.memory_space<vmem>>, vector<32x32xbf16>
    %cst_49 = arith.constant dense<0.000000e+00> : vector<2x32xf32>
    %68 = tpu.matmul %66, %67, %cst_49 {dimension_numbers = #tpu.dot_dimension_numbers<[1], [0], [0], [1], [0, 0, 1, 1], [], []>} : vector<2x32xbf16>, vector<32x32xbf16>, vector<2x32xf32> -> vector<2x32xf32>
    %c12 = arith.constant 12 : index
    %c0_50 = arith.constant 0 : index
    %69 = vector.load %arg6[%c12, %c0_50] : memref<16x32xbf16, #tpu.memory_space<vmem>>, vector<2x32xbf16>
    %70 = arith.extf %69 : vector<2x32xbf16> to vector<2x32xf32>
    %71 = arith.addf %70, %68 : vector<2x32xf32>
    %72 = math.tanh %71 : vector<2x32xf32>
    %73 = arith.truncf %72 : vector<2x32xf32> to vector<2x32xbf16>
    %c12_51 = arith.constant 12 : index
    %c0_52 = arith.constant 0 : index
    %74 = vector.load %arg6[%c12_51, %c0_52] : memref<16x32xbf16, #tpu.memory_space<vmem>>, vector<2x32xbf16>
    tpu.vector_store %arg6[%c12_51, %c0_52], %73 {strides = array<i32>} : memref<16x32xbf16, #tpu.memory_space<vmem>>, vector<2x32xbf16>,
    %75 = arith.truncf %72 : vector<2x32xf32> to vector<2x32xbf16>
    %c0_53 = arith.constant 0 : index
    %c0_54 = arith.constant 0 : index
    %76 = vector.load %arg3[%c0_53, %c0_54] : memref<32x32xbf16, #tpu.memory_space<vmem>>, vector<32x32xbf16>
    %cst_55 = arith.constant dense<0.000000e+00> : vector<2x32xf32>
    %77 = tpu.matmul %75, %76, %cst_55 {dimension_numbers = #tpu.dot_dimension_numbers<[1], [0], [0], [1], [0, 0, 1, 1], [], []>} : vector<2x32xbf16>, vector<32x32xbf16>, vector<2x32xf32> -> vector<2x32xf32>
    %c14 = arith.constant 14 : index
    %c0_56 = arith.constant 0 : index
    %78 = vector.load %arg6[%c14, %c0_56] : memref<16x32xbf16, #tpu.memory_space<vmem>>, vector<2x32xbf16>
    %79 = arith.extf %78 : vector<2x32xbf16> to vector<2x32xf32>
    %80 = arith.addf %79, %77 : vector<2x32xf32>
    %81 = math.tanh %80 : vector<2x32xf32>
    %82 = arith.truncf %81 : vector<2x32xf32> to vector<2x32xbf16>
    %c14_57 = arith.constant 14 : index
    %c0_58 = arith.constant 0 : index
    %83 = vector.load %arg6[%c14_57, %c0_58] : memref<16x32xbf16, #tpu.memory_space<vmem>>, vector<2x32xbf16>
    tpu.vector_store %arg6[%c14_57, %c0_58], %82 {strides = array<i32>} : memref<16x32xbf16, #tpu.memory_space<vmem>>, vector<2x32xbf16>,
    %c0_59 = arith.constant 0 : index
    %c0_60 = arith.constant 0 : index
    %84 = vector.load %arg8[%c0_59, %c0_60] : memref<2x32xf32, #tpu.memory_space<vmem>>, vector<2x32xf32>
    tpu.vector_store %arg8[%c0_59, %c0_60], %81 {strides = array<i32>} : memref<2x32xf32, #tpu.memory_space<vmem>>, vector<2x32xf32>,
    %c0_i32_61 = arith.constant 0 : i32
    %85 = arith.cmpi eq, %arg0, %c0_i32_61 : i32
    %86 = arith.extui %85 : i1 to i32
    %c0_i32_62 = arith.constant 0 : i32
    %87 = arith.cmpi ne, %86, %c0_i32_62 : i32
    scf.if %87 {
      %c0_63 = arith.constant 0 : index
      %c0_64 = arith.constant 0 : index
      %88 = vector.load %arg7[%c0_63, %c0_64] : memref<2x32xf32, #tpu.memory_space<vmem>>, vector<2x32xf32>
      tpu.vector_store %arg7[%c0_63, %c0_64], %81 {strides = array<i32>} : memref<2x32xf32, #tpu.memory_space<vmem>>, vector<2x32xf32>,
    } else {
    }
    return
  }
  func.func @transform_0(%arg0: i32) -> (i32, i32) {
    %c0_i32 = arith.constant 0 : i32
    %c0_i32_0 = arith.constant 0 : i32
    return %arg0, %c0_i32 : i32, i32
  }
  func.func @transform_1(%arg0: i32) -> (i32, i32) {
    %c0_i32 = arith.constant 0 : i32
    %c0_i32_0 = arith.constant 0 : i32
    %c0_i32_1 = arith.constant 0 : i32
    return %c0_i32, %c0_i32_0 : i32, i32
  }
  func.func @transform_2(%arg0: i32) -> (i32, i32) {
    %c0_i32 = arith.constant 0 : i32
    %c0_i32_0 = arith.constant 0 : i32
    %c0_i32_1 = arith.constant 0 : i32
    return %c0_i32, %c0_i32_0 : i32, i32
  }
  func.func @transform_3(%arg0: i32) -> (i32, i32) {
    %c0_i32 = arith.constant 0 : i32
    %c0_i32_0 = arith.constant 0 : i32
    %c0_i32_1 = arith.constant 0 : i32
    return %c0_i32, %c0_i32_0 : i32, i32
  }
  func.func @transform_4(%arg0: i32) -> (i32, i32) {
    %c0_i32 = arith.constant 0 : i32
    %c0_i32_0 = arith.constant 0 : i32
    %c0_i32_1 = arith.constant 0 : i32
    return %c0_i32, %c0_i32_0 : i32, i32
  }
  func.func @transform_5(%arg0: i32) -> (i32, i32) {
    %c0_i32 = arith.constant 0 : i32
    %c0_i32_0 = arith.constant 0 : i32
    return %arg0, %c0_i32 : i32, i32
  }
  func.func @transform_6(%arg0: i32) -> (i32, i32) {
    %c0_i32 = arith.constant 0 : i32
    %c0_i32_0 = arith.constant 0 : i32
    %c0_i32_1 = arith.constant 0 : i32
    return %c0_i32, %c0_i32_0 : i32, i32
  }
}

</mosaic_0001>

<bundles_post_ra>
// kernel: tpu_custom_call.1
= control target key start
LH: loop header
LB: loop body
LE: loop exit
PB: predicated region body
PF: predicated region fallthrough
CT: control target
= control target key end

     0   :  { %12 = vsyncpa [#allocation4], 0  ;;  %s1165_s0 = inlined_call_operand.hbm [shape: bf16[16,32], index: 0, kind: input, shape index: {}]   ;;  %s1166_s1 = inlined_call_operand.hbm [shape: bf16[32,32], index: 1, kind: input, shape index: {}]   ;;  %s1167_s2 = inlined_call_operand.hbm [shape: bf16[32,32], index: 2, kind: input, shape index: {}]   ;;  %s1168_s3 = inlined_call_operand.vmem [shape: f32[1,32], index: 3, kind: input, shape index: {}]   ;;  %s1169_s4 = inlined_call_operand.vmem [shape: f32[2,32], index: 4, kind: input, shape index: {}]   ;;  %s1170_s5 = inlined_call_operand.hbm [shape: bf16[16,32], index: 5, kind: output, shape index: {0}]   ;;  %s1171_s6 = inlined_call_operand.hbm [shape: f32[2,32], index: 6, kind: output, shape index: {1}]  }
   0x1   :  { %13 = vsyncpa [#allocation7], 0 }
   0x2   :  { %14 = vsyncpa [#allocation5], 0 }
   0x3   :  { %15 = vsyncpa [#allocation11], 0  ;;  %s1035_s21 = smov [#allocation6]   ;;  %s1036_s23 = smov [#allocation3]  }
   0x4   :  { %s33_s22 = sshll.u32 %s1035_s21, 4  ;;  %s21_s24 = sshll.u32 %s1036_s23, 4  ;;  %s34_s22 = int_to_ptr.vmem [resolvable:$true] %s33_s22  ;;  %s22_s24 = int_to_ptr.vmem [resolvable:$true] %s21_s24 }
   0x5   :  { %s935_s25 = scalar_lea.vmem %s34_s22, 256  ;;  %p940_p1 = scmp.lt.s32.totalorder %s34_s22, %s34_s22 }
   0x6   :  { %p936_p0 = scmp.ne.s32.totalorder %s34_s22, %s935_s25  ;;  %p941_p2 = scmp.lt.s32.totalorder %s935_s25, %s935_s25 }
   0x8   :  { %p942_p3 = por %p941_p2, %p940_p1 }
   0xa   :  { %p943_p4 = pnand %p942_p3, %p936_p0 }
   0xc   :  { %946 = shalt.err (!%p943_p4)
}
   0xd   :  { %s1037_s26 = smov 64   ;;  %s1038_s27 = smov 4  }
   0xe   :  { %39 = dma.hbm_to_vmem [thread:$0]  %s1166_s1, 256, %s34_s22, [#allocation7], %s1037_s26, %s1037_s26, %s1038_s27  }
   0xf   :  { %s955_s30 = scalar_lea.vmem %s22_s24, 128  ;;  %p960_p6 = scmp.lt.s32.totalorder %s22_s24, %s22_s24 }
  0x10   :  { %p956_p5 = scmp.ne.s32.totalorder %s22_s24, %s955_s30  ;;  %p961_p7 = scmp.lt.s32.totalorder %s955_s30, %s955_s30 }
  0x12   :  { %p962_p8 = por %p961_p7, %p960_p6 }
  0x14   :  { %p963_p9 = pnand %p962_p8, %p956_p5 }
  0x16   :  { %966 = shalt.err (!%p963_p9)
}
  0x17   :  { %27 = dma.hbm_to_vmem [thread:$0]  %s1165_s0, 128, %s22_s24, [#allocation4], %s1037_s26, %s1037_s26, %s1038_s27  }
  0x18   :  { %s1039_s9 = smov [#allocation8]  }
  0x19   :  { %s45_s10 = sshll.u32 %s1039_s9, 4  ;;  %s46_s10 = int_to_ptr.vmem [resolvable:$true] %s45_s10 }
  0x1a   :  { %s975_s11 = scalar_lea.vmem %s46_s10, 256  ;;  %p980_p11 = scmp.lt.s32.totalorder %s46_s10, %s46_s10 }
  0x1b   :  { %p976_p10 = scmp.ne.s32.totalorder %s46_s10, %s975_s11  ;;  %p981_p12 = scmp.lt.s32.totalorder %s975_s11, %s975_s11 }
  0x1d   :  { %p982_p13 = por %p981_p12, %p980_p11 }
  0x1f   :  { %p983_p0 = pnand %p982_p13, %p976_p10 }
  0x21   :  { %986 = shalt.err (!%p983_p0)
}
  0x22   :  { %51 = dma.hbm_to_vmem [thread:$0]  %s1167_s2, 256, %s46_s10, [#allocation7], %s1037_s26, %s1037_s26, %s1038_s27  }
  0x23   :  { %1027 = dma.done.wait [#allocation4], 128  }
  0x24   :  { %1028 = vsyncadd [#allocation4], 4294967168 }
  0x25   :  { %1029 = dma.done.wait [#allocation7], 512  }
  0x26   :  { %1030 = vsyncadd [#allocation7], 4294966784  ;;  %v1040_v0 = vmov 0.0   ;;  %vm1041_vm0 = vmmov 0   ;;  %v892_v1 = vld [vmem:[#allocation6 + $0x8] sm:$0xff]   ;;  %v893_v2 = vld [vmem:[#allocation6] sm:$0xff]  }
  0x27   :  { %811 = vmatprep.subr.bf16.mxu0 %v1040_v0  ;;  %815 = vmatprep.mubr.msk.bf16.mxu0 %vm1041_vm0, %v1040_v0  ;;  %v895_v3 = vld [vmem:[#allocation8 + $0x8] sm:$0xff]   ;;  %vm71_vm1 = vcmask 254976   ;;  %vm103_vm2 = vcmask 261120   ;;  %v896_v5 = vld [vmem:[#allocation8] sm:$0xff]   ;;  %vm156_vm3 = vcmask 257024   ;;  %vm225_vm4 = vcmask 253952  }
  0x28   :  { %819 = vmatprep.subr.bf16.mxu1 %v1040_v0  ;;  %823 = vmatprep.mubr.msk.bf16.mxu1 %vm1041_vm0, %v1040_v0  ;;  %v894_v4 = vld [vmem:[#allocation3] sm:$0xff]   ;;  %v70_v6 = vld [vmem:[%s1169_s4] sm:$0x3]  ;;  %vm294_vm5 = vcmask 254977   ;;  %vm365_vm6 = vcmask 256002   ;;  %vm436_vm7 = vcmask 257027  }
  0x29   :  { %812 = vmatpush3.bf16.msra.mxu0 %v892_v1  ;;  %820 = vmatpush3.bf16.msra.mxu1 %v895_v3  ;;  %72 = vst.msk [vmem:[#allocation2] sm:$0x3] %vm71_vm1, %v70_v6  ;;  %v897_v9 = vld [vmem:[#allocation8 + $0x8] sm:$0xff]   ;;  %v898_v10 = vld [vmem:[#allocation8] sm:$0xff]   ;;  %s1043_s15 = smov [#allocation9]   ;;  %vm713_vm8 = vcmask 261126  }
  0x2a   :  { %813 = vmatprep.subr.bf16.mxu0 %v1040_v0  ;;  %821 = vmatprep.subr.bf16.mxu1 %v1040_v0  ;;  %v751_v11 = vld [vmem:[%s1168_s3] ss:$0 sm:$0xff]  ;;  %v899_v29 = vld [vmem:[#allocation8 + $0x8] sm:$0xff]   ;;  %s1042_s3 = smov [#allocation10]   ;;  %s724_s16 = sshll.u32 %s1043_s15, 4  ;;  %s725_s16 = int_to_ptr.vmem [resolvable:$true] %s724_s16 }
  0x2b   :  { %v900_v30 = vld [vmem:[#allocation8] sm:$0xff]   ;;  %v901_v42 = vld [vmem:[#allocation8 + $0x8] sm:$0xff]   ;;  %s737_s14 = sshll.u32 %s1042_s3, 4  ;;  %s738_s14 = int_to_ptr.vmem [resolvable:$true] %s737_s14 }
  0x2c   :  { %v902_v43 = vld [vmem:[#allocation8] sm:$0xff]   ;;  %v903_v55 = vld [vmem:[#allocation8 + $0x8] sm:$0xff]   ;;  %s987_s17 = scalar_lea.vmem %s738_s14, 32  ;;  %p992_p2 = scmp.lt.s32.totalorder %s738_s14, %s738_s14 }
  0x2d   :  { %814 = vmatpush3.bf16.msra.mxu0 %v893_v2  ;;  %822 = vmatpush3.bf16.msra.mxu1 %v896_v5  ;;  %v904_v56 = vld [vmem:[#allocation8] sm:$0xff]   ;;  %v905_v5 = vld [vmem:[#allocation8 + $0x8] sm:$0xff]   ;;  %p988_p1 = scmp.ne.s32.totalorder %s738_s14, %s987_s17  ;;  %p993_p3 = scmp.lt.s32.totalorder %s987_s17, %s987_s17 }
  0x2e   :  { %827 = vmatprep.subr.bf16.mxu0 %v1040_v0  ;;  %835 = vmatprep.subr.bf16.mxu1 %v1040_v0  ;;  %v906_v6 = vld [vmem:[#allocation8] sm:$0xff]  }
  0x2f   :  { %p994_p4 = por %p993_p3, %p992_p2 }
  0x30   :  { %816 = vmatmul.mubr.msk.bf16.vlgmr.msra.gmra.mxu0 %vm103_vm2, %v894_v4  ;;  %v159_v7 = vld [vmem:[#allocation2] sm:$0x3] }
  0x31   :  { %831 = vmatprep.mubr.msk.bf16.mxu0 %vm1041_vm0, %v1040_v0  ;;  %v160_v8 = vpack.c.bf16 %v159_v7, %v159_v7  ;;  %828 = vmatpush3.bf16.msra.mxu0 %v897_v9  ;;  %p995_p5 = pnand %p994_p4, %p988_p1 }
  0x32   :  { %829 = vmatprep.subr.bf16.mxu0 %v1040_v0 }
  0x33   :  { %824 = vmatmul.mubr.msk.bf16.vlgmr.msra.gmra.mxu1 %vm103_vm2, %v160_v8 }
  0x34   :  { %839 = vmatprep.mubr.msk.bf16.mxu1 %vm1041_vm0, %v1040_v0  ;;  %836 = vmatpush3.bf16.msra.mxu1 %v899_v29  ;;  %v909_v29 = vld [vmem:[#allocation8 + $0x8] sm:$0xff]  }
  0x35   :  { %830 = vmatpush3.bf16.msra.mxu0 %v898_v10  ;;  %837 = vmatprep.subr.bf16.mxu1 %v1040_v0 }
  0x36   :  { %843 = vmatprep.subr.bf16.mxu0 %v1040_v0 }
  0x38   :  { %838 = vmatpush3.bf16.msra.mxu1 %v900_v30  ;;  %v910_v30 = vld [vmem:[#allocation8] sm:$0xff]  }
  0x39   :  { %851 = vmatprep.subr.bf16.mxu1 %v1040_v0 }
  0xf0   :  { %v141_v12 = vpop.f32.mrf.mxu0 }
  0xf1   :  { %v142_v13 = vadd.f32 %v751_v11, %v141_v12 }
  0xf2   :  { %v817_v14 = vpop.f32.mrf.mxu0 }
  0xf3   :  { %v782_v15 = vpack.c.bf16 %v142_v13, %v142_v13  ;;  %v214_v20 = vpop.f32.mrf.mxu1 }
  0xf4   :  { %v144_v16 = vpop.f32.mrf.mxu0 }
  0xf5   :  { %157 = vst.msk [vmem:[#allocation9] sm:$0xf] %vm156_vm3, %v782_v15  ;;  %v145_v17 = vadd.f32 %v751_v11, %v144_v16  ;;  %v825_v21 = vpop.f32.mrf.mxu1  ;;  %v907_v16 = vld [vmem:[#allocation8 + $0x8] sm:$0xff]  }
  0xf6   :  { %v818_v18 = vpop.f32.mrf.mxu0 }
  0xf7   :  { %v783_v19 = vpack.c.bf16 %v145_v17, %v145_v17  ;;  %v217_v22 = vpop.f32.mrf.mxu1  ;;  %v908_v17 = vld [vmem:[#allocation8] sm:$0xff]  }
  0xf9   :  { %158 = vst.msk [vmem:[#allocation9 + $0x4] sm:$0xf] %vm156_vm3, %v783_v19  ;;  %v826_v25 = vpop.f32.mrf.mxu1 }
  0xfc   :  { %v220_v23 = vld [vmem:[#allocation9] sm:$0x1]  ;;  %v286_v31 = vld [vmem:[#allocation9] sm:$0x2]  ;;  %v357_v44 = vld [vmem:[#allocation9] sm:$0x4] }
  0xfd   :  { %v221_v24 = vunpack.c.l.bf16 %v220_v23  ;;  %v287_v33 = vunpack.c.l.bf16 %v286_v31  ;;  %v358_v46 = vunpack.c.l.bf16 %v357_v44  ;;  %v428_v57 = vld [vmem:[#allocation9] sm:$0x8] }
  0xfe   :  { %v429_v59 = vunpack.c.l.bf16 %v428_v57 }
  0xff   :  { %v222_v26 = vadd.f32 %v221_v24, %v214_v20 }
 0x100   :  { %v499_v7 = vld [vmem:[#allocation9 + $0x4] sm:$0x1]  ;;  %v564_v18 = vld [vmem:[#allocation9 + $0x4] sm:$0x2]  ;;  %v634_v31 = vld [vmem:[#allocation9 + $0x4] sm:$0x4] }
 0x101   :  { %911 = vtanh.f32 %v222_v26  ;;  %v500_v8 = vunpack.c.l.bf16 %v499_v7  ;;  %v565_v20 = vunpack.c.l.bf16 %v564_v18 }
 0x10e   :  { %v912_v27 = vpop.eup %911 }
 0x10f   :  { %v224_v28 = vpack.c.bf16 %v912_v27, %v912_v27 }
 0x111   :  { %226 = vst.msk [vmem:[#allocation9] sm:$0x1] %vm225_vm4, %v224_v28  ;;  %832 = vmatmul.mubr.msk.bf16.vlgmr.msra.gmra.mxu0 %vm103_vm2, %v224_v28 }
 0x112   :  { %847 = vmatprep.mubr.msk.bf16.mxu0 %vm1041_vm0, %v1040_v0  ;;  %844 = vmatpush3.bf16.msra.mxu0 %v901_v42  ;;  %v704_v42 = vld [vmem:[#allocation9 + $0x4] sm:$0x8] }
 0x113   :  { %845 = vmatprep.subr.bf16.mxu0 %v1040_v0 }
 0x116   :  { %846 = vmatpush3.bf16.msra.mxu0 %v902_v43  ;;  %v705_v43 = vunpack.c.l.bf16 %v704_v42 }
 0x117   :  { %859 = vmatprep.subr.bf16.mxu0 %v1040_v0 }
 0x1d1   :  { %v280_v32 = vpop.f32.mrf.mxu0 }
 0x1d2   :  { %v289_v34 = vrot.slane %v280_v32, 6 }
 0x1d3   :  { %v833_v35 = vpop.f32.mrf.mxu0 }
 0x1d4   :  { %v291_v36 = vadd.f32 %v289_v34, %v287_v33  ;;  %v635_v33 = vunpack.c.l.bf16 %v634_v31 }
 0x1d5   :  { %v283_v37 = vpop.f32.mrf.mxu0 }
 0x1d6   :  { %913 = vtanh.f32 %v291_v36 }
 0x1d7   :  { %v834_v38 = vpop.f32.mrf.mxu0 }
 0x1e3   :  { %v914_v39 = vpop.eup %913 }
 0x1e4   :  { %v293_v40 = vpack.c.bf16 %v914_v39, %v914_v39 }
 0x1e6   :  { %295 = vst.msk [vmem:[#allocation9] sm:$0x2] %vm294_vm5, %v293_v40  ;;  %v301_v41 = vrot.slane %v293_v40, 1 }
 0x1e8   :  { %840 = vmatmul.mubr.msk.bf16.vlgmr.msra.gmra.mxu1 %vm103_vm2, %v301_v41 }
 0x1e9   :  { %855 = vmatprep.mubr.msk.bf16.mxu1 %vm1041_vm0, %v1040_v0  ;;  %852 = vmatpush3.bf16.msra.mxu1 %v903_v55 }
 0x1ea   :  { %853 = vmatprep.subr.bf16.mxu1 %v1040_v0 }
 0x1ed   :  { %854 = vmatpush3.bf16.msra.mxu1 %v904_v56 }
 0x1ee   :  { %867 = vmatprep.subr.bf16.mxu1 %v1040_v0 }
 0x2a8   :  { %v351_v45 = vpop.f32.mrf.mxu1 }
 0x2a9   :  { %v360_v47 = vrot.slane %v351_v45, 4 }
 0x2aa   :  { %v841_v48 = vpop.f32.mrf.mxu1 }
 0x2ab   :  { %v362_v49 = vadd.f32 %v360_v47, %v358_v46 }
 0x2ac   :  { %v354_v50 = vpop.f32.mrf.mxu1 }
 0x2ad   :  { %915 = vtanh.f32 %v362_v49 }
 0x2ae   :  { %v842_v51 = vpop.f32.mrf.mxu1 }
 0x2ba   :  { %v916_v52 = vpop.eup %915 }
 0x2bb   :  { %v364_v53 = vpack.c.bf16 %v916_v52, %v916_v52 }
 0x2bd   :  { %366 = vst.msk [vmem:[#allocation9] sm:$0x4] %vm365_vm6, %v364_v53  ;;  %v372_v54 = vrot.slane %v364_v53, 2 }
 0x2bf   :  { %848 = vmatmul.mubr.msk.bf16.vlgmr.msra.gmra.mxu0 %vm103_vm2, %v372_v54 }
 0x2c0   :  { %863 = vmatprep.mubr.msk.bf16.mxu0 %vm1041_vm0, %v1040_v0  ;;  %860 = vmatpush3.bf16.msra.mxu0 %v905_v5 }
 0x2c1   :  { %861 = vmatprep.subr.bf16.mxu0 %v1040_v0 }
 0x2c4   :  { %862 = vmatpush3.bf16.msra.mxu0 %v906_v6 }
 0x2c5   :  { %875 = vmatprep.subr.bf16.mxu0 %v1040_v0 }
 0x37f   :  { %v422_v58 = vpop.f32.mrf.mxu0 }
 0x380   :  { %v431_v60 = vrot.slane %v422_v58, 2 }
 0x381   :  { %v849_v61 = vpop.f32.mrf.mxu0 }
 0x382   :  { %v433_v62 = vadd.f32 %v431_v60, %v429_v59 }
 0x383   :  { %v425_v63 = vpop.f32.mrf.mxu0 }
 0x384   :  { %917 = vtanh.f32 %v433_v62 }
 0x385   :  { %v850_v1 = vpop.f32.mrf.mxu0 }
 0x391   :  { %v918_v2 = vpop.eup %917 }
 0x392   :  { %v435_v3 = vpack.c.bf16 %v918_v2, %v918_v2 }
 0x394   :  { %437 = vst.msk [vmem:[#allocation9] sm:$0x8] %vm436_vm7, %v435_v3  ;;  %v443_v4 = vrot.slane %v435_v3, 3 }
 0x396   :  { %856 = vmatmul.mubr.msk.bf16.vlgmr.msra.gmra.mxu1 %vm103_vm2, %v443_v4 }
 0x397   :  { %871 = vmatprep.mubr.msk.bf16.mxu1 %vm1041_vm0, %v1040_v0  ;;  %868 = vmatpush3.bf16.msra.mxu1 %v907_v16 }
 0x398   :  { %869 = vmatprep.subr.bf16.mxu1 %v1040_v0 }
 0x39b   :  { %870 = vmatpush3.bf16.msra.mxu1 %v908_v17 }
 0x456   :  { %v493_v9 = vpop.f32.mrf.mxu1 }
 0x457   :  { %v501_v10 = vadd.f32 %v500_v8, %v493_v9 }
 0x458   :  { %v857_v11 = vpop.f32.mrf.mxu1 }
 0x459   :  { %919 = vtanh.f32 %v501_v10 }
 0x45a   :  { %v496_v12 = vpop.f32.mrf.mxu1 }
 0x45c   :  { %v858_v13 = vpop.f32.mrf.mxu1 }
 0x466   :  { %v920_v14 = vpop.eup %919 }
 0x467   :  { %v503_v15 = vpack.c.bf16 %v920_v14, %v920_v14 }
 0x469   :  { %504 = vst.msk [vmem:[#allocation9 + $0x4] sm:$0x1] %vm225_vm4, %v503_v15  ;;  %864 = vmatmul.mubr.msk.bf16.vlgmr.msra.gmra.mxu0 %vm103_vm2, %v503_v15 }
 0x46a   :  { %879 = vmatprep.mubr.msk.bf16.mxu0 %vm1041_vm0, %v1040_v0  ;;  %876 = vmatpush3.bf16.msra.mxu0 %v909_v29 }
 0x46b   :  { %877 = vmatprep.subr.bf16.mxu0 %v1040_v0 }
 0x46e   :  { %878 = vmatpush3.bf16.msra.mxu0 %v910_v30 }
 0x529   :  { %v558_v19 = vpop.f32.mrf.mxu0 }
 0x52a   :  { %v567_v21 = vrot.slane %v558_v19, 6 }
 0x52b   :  { %v865_v22 = vpop.f32.mrf.mxu0 }
 0x52c   :  { %v569_v23 = vadd.f32 %v567_v21, %v565_v20 }
 0x52d   :  { %v561_v24 = vpop.f32.mrf.mxu0 }
 0x52e   :  { %921 = vtanh.f32 %v569_v23 }
 0x52f   :  { %v866_v25 = vpop.f32.mrf.mxu0 }
 0x53b   :  { %v922_v26 = vpop.eup %921 }
 0x53c   :  { %v571_v27 = vpack.c.bf16 %v922_v26, %v922_v26 }
 0x53e   :  { %572 = vst.msk [vmem:[#allocation9 + $0x4] sm:$0x2] %vm294_vm5, %v571_v27  ;;  %v578_v28 = vrot.slane %v571_v27, 1 }
 0x540   :  { %872 = vmatmul.mubr.msk.bf16.vlgmr.msra.gmra.mxu1 %vm103_vm2, %v578_v28 }
 0x600   :  { %v628_v32 = vpop.f32.mrf.mxu1 }
 0x601   :  { %v637_v34 = vrot.slane %v628_v32, 4 }
 0x602   :  { %v873_v35 = vpop.f32.mrf.mxu1 }
 0x603   :  { %v639_v36 = vadd.f32 %v637_v34, %v635_v33 }
 0x604   :  { %v631_v37 = vpop.f32.mrf.mxu1 }
 0x605   :  { %923 = vtanh.f32 %v639_v36 }
 0x606   :  { %v874_v38 = vpop.f32.mrf.mxu1 }
 0x612   :  { %v924_v39 = vpop.eup %923 }
 0x613   :  { %v641_v40 = vpack.c.bf16 %v924_v39, %v924_v39 }
 0x615   :  { %642 = vst.msk [vmem:[#allocation9 + $0x4] sm:$0x4] %vm365_vm6, %v641_v40  ;;  %v648_v41 = vrot.slane %v641_v40, 2 }
 0x617   :  { %880 = vmatmul.mubr.msk.bf16.vlgmr.msra.gmra.mxu0 %vm103_vm2, %v648_v41 }
 0x6d7   :  { %v698_v0 = vpop.f32.mrf.mxu0 }
 0x6d8   :  { %v707_v44 = vrot.slane %v698_v0, 2 }
 0x6d9   :  { %v881_v45 = vpop.f32.mrf.mxu0 }
 0x6da   :  { %v709_v46 = vadd.f32 %v707_v44, %v705_v43 }
 0x6db   :  { %v701_v47 = vpop.f32.mrf.mxu0 }
 0x6dc   :  { %925 = vtanh.f32 %v709_v46 }
 0x6dd   :  { %v882_v48 = vpop.f32.mrf.mxu0 }
 0x6e9   :  { %v926_v49 = vpop.eup %925 }
 0x6ea   :  { %v711_v50 = vpack.c.bf16 %v926_v49, %v926_v49  ;;  %714 = vst.msk [vmem:[#allocation2 - $0x6] sm:$0xc0] %vm713_vm8, %v926_v49  ;;  %718 = vst.msk [vmem:[#allocation10 - $0x6] sm:$0xc0] %vm713_vm8, %v926_v49 }
 0x6eb   :  { %998 = shalt.err (!%p995_p5)
}
 0x6ec   :  { %740 = dma.vmem_to_hbm [thread:$0]  %s738_s14, 32, %s1171_s6, [#allocation11]   ;;  %712 = vst.msk [vmem:[#allocation9 + $0x4] sm:$0x8] %vm436_vm7, %v711_v50 }
 0x6ed   :  { %s1007_s20 = scalar_lea.vmem %s725_s16, 128  ;;  %p1012_p7 = scmp.lt.s32.totalorder %s725_s16, %s725_s16 }
 0x6ee   :  { %p1008_p6 = scmp.ne.s32.totalorder %s725_s16, %s1007_s20  ;;  %p1013_p8 = scmp.lt.s32.totalorder %s1007_s20, %s1007_s20 }
 0x6f0   :  { %p1014_p9 = por %p1013_p8, %p1012_p7 }
 0x6f2   :  { %p1015_p10 = pnand %p1014_p9, %p1008_p6 }
 0x6f4   :  { %1018 = shalt.err (!%p1015_p10)
}
 0x6f5   :  { %730 = dma.vmem_to_hbm [thread:$0]  %s725_s16, 128, %s1170_s5, [#allocation5], %s1037_s26, %s1037_s26, %s1038_s27  }
 0x6f6   :  { %1031 = dma.done.wait [#allocation5], 128  }
 0x6f7   :  { %1032 = vsyncadd [#allocation5], 4294967168 }
 0x6f8   :  { %1033 = dma.done.wait [#allocation11], 32  }
 0x6f9   :  { %1034 = vsyncadd [#allocation11], 4294967264 }
 0x6fa   :  { %747 = vsyncpa [#allocation4], 1 }
 0x6fb   :  { %748 = vsyncpa [#allocation7], 1 }
 0x6fc   :  { %749 = vsyncpa [#allocation5], 1 }
 0x6fd   :  { %750 = vsyncpa [#allocation11], 1 }

</bundles_post_ra>
